<compile_context>
chip_gen: v7x
topology: tpu7x:2x2x1
jax: 0.10.0
libtpu: 0.0.40
codegen_flags: <defaults>
</compile_context>

<pallas_src>
import functools

import jax
import jax.numpy as jnp
from jax import lax
from jax.experimental import pallas as pl
from jax.experimental.pallas import tpu as pltpu


def lstm_fc_kernel(inproj_ref, whh_ref, h0_ref, c0_ref, wfc_ref, bfc_ref,
                   out_ref, *, hidden_dim):
    """LSTM recurrence (input projection pre-folded) + final Linear.

    inproj_ref : (seq, batch, 4*hidden) f32  x_t @ W_ih^T + b_ih + b_hh  (per token)
    whh_ref    : (hidden, 4*hidden)     f32  weight_hh_l0^T
    h0_ref     : (batch, hidden)        f32  initial hidden state
    c0_ref     : (batch, hidden)        f32  initial cell state
    wfc_ref    : (hidden, output)       f32  fc.weight^T
    bfc_ref    : (1, output)            f32  fc.bias
    out_ref    : (batch, output)        f32
    """
    H = hidden_dim
    seq_len = inproj_ref.shape[0]
    batch = inproj_ref.shape[1]

    whh = whh_ref[...]

    # Static lane mask: which of the 4H lanes belong to the "g" (tanh) gate.
    lane = lax.broadcasted_iota(jnp.int32, (batch, 4 * H), 1)
    is_g = jnp.logical_and(lane >= 2 * H, lane < 3 * H)
    # Pre-scale: tanh(x/2) lanes for i/f/o (sigmoid fixup below), tanh(x) for g.
    scale = jnp.where(is_g, jnp.float32(1.0), jnp.float32(0.5))

    def step(t, carry):
        h, c = carry
        # One lane-dense (batch, 4H) vreg per timestep + the only per-step matmul.
        gates = inproj_ref[t] + jnp.dot(h, whh,
                                        preferred_element_type=jnp.float32)
        # Single full-vreg EUP tanh; cheap VPU fixup turns i/f/o lanes into sigmoid.
        th = jnp.tanh(gates * scale)
        act = jnp.where(is_g, th, 0.5 * th + 0.5)

        i_g = act[:, 0 * H:1 * H]
        f_g = act[:, 1 * H:2 * H]
        g_g = act[:, 2 * H:3 * H]
        o_g = act[:, 3 * H:4 * H]

        c_new = f_g * c + i_g * g_g
        h_new = o_g * jnp.tanh(c_new)
        return (h_new, c_new)

    # Short static trip count: fully unroll for LLO scheduling visibility.
    h_last, _ = lax.fori_loop(0, seq_len, step,
                              (h0_ref[...], c0_ref[...]), unroll=True)

    # Final Linear on the last hidden state (== LSTM output at last step).
    out_ref[...] = (jnp.dot(h_last, wfc_ref[...],
                            preferred_element_type=jnp.float32)
                    + bfc_ref[...])


def template_matching_lstm_forward(x, params, h0, c0):
    """x: (batch, seq) int32; returns (batch, output_dim) f32."""
    emb_table = params["embedding"]            # (vocab, hidden)
    hidden_dim = emb_table.shape[1]

    # Fold the input projection + bias into the embedding table once:
    #   (vocab, hidden) @ (hidden, 4*hidden) + (1, 4*hidden) -> (vocab, 4*hidden)
    inproj_table = emb_table @ params["w_ih_t"] + params["bias"]
    # Gather with x^T so the result is already (seq, batch, 4*hidden) —
    # lane-dense last dim (4H = 128), no transpose of the big activation array.
    inproj = jnp.take(inproj_table, x.T, axis=0)   # (seq, batch, 4*hidden)

    batch = x.shape[0]
    output_dim = params["fc_w_t"].shape[1]

    kernel = functools.partial(lstm_fc_kernel, hidden_dim=hidden_dim)

    full = lambda a: pl.BlockSpec(a.shape, lambda: tuple(0 for _ in a.shape))
    args = (inproj, params["w_hh_t"], h0, c0, params["fc_w_t"], params["fc_b"])

    # TODO(synk): if batch/seq ever scale up, add a batch-parallel grid
    # (dimension_semantics=("parallel",)) and stream timesteps via BlockSpec
    # instead of keeping the whole inproj slab VMEM-resident.
    out = pl.pallas_call(
        kernel,
        out_shape=jax.ShapeDtypeStruct((batch, output_dim), jnp.float32),
        in_specs=[full(a) for a in args],
        out_specs=pl.BlockSpec((batch, output_dim), lambda: (0, 0)),
        compiler_params=pltpu.CompilerParams(vmem_limit_bytes=4 << 20),
    )(*args)
    return out


def init_params(key, vocab_size, hidden_dim, output_dim):
    """Deterministic parameter init mirroring nn.Embedding / nn.LSTM / nn.Linear shapes."""
    ks = jax.random.split(key, 8)
    k_lstm = 1.0 / jnp.sqrt(hidden_dim)

    embedding = jax.random.normal(ks[0], (vocab_size, hidden_dim), jnp.float32)

    w_ih = jax.random.uniform(ks[1], (4 * hidden_dim, hidden_dim),
                              jnp.float32, -k_lstm, k_lstm)
    w_hh = jax.random.uniform(ks[2], (4 * hidden_dim, hidden_dim),
                              jnp.float32, -k_lstm, k_lstm)
    b_ih = jax.random.uniform(ks[3], (4 * hidden_dim,), jnp.float32,
                              -k_lstm, k_lstm)
    b_hh = jax.random.uniform(ks[4], (4 * hidden_dim,), jnp.float32,
                              -k_lstm, k_lstm)

    k_fc = 1.0 / jnp.sqrt(hidden_dim)
    fc_w = jax.random.uniform(ks[5], (output_dim, hidden_dim), jnp.float32,
                              -k_fc, k_fc)
    fc_b = jax.random.uniform(ks[6], (output_dim,), jnp.float32, -k_fc, k_fc)

    return {
        "embedding": embedding,
        "w_ih_t": w_ih.T,                               # (hidden, 4*hidden)
        "w_hh_t": w_hh.T,                               # (hidden, 4*hidden)
        "bias": (b_ih + b_hh).reshape(1, 4 * hidden_dim),
        "fc_w_t": fc_w.T,                               # (hidden, output)
        "fc_b": fc_b.reshape(1, output_dim),
    }


def reference_forward(x, params, h0, c0):
    """Pure-JAX reference of the PyTorch forward (same gate order / math)."""
    H = params["embedding"].shape[1]
    emb = jnp.take(params["embedding"], x, axis=0)   # (batch, seq, hidden)
    h, c = h0, c0
    for t in range(x.shape[1]):
        x_t = emb[:, t, :]
        gates = x_t @ params["w_ih_t"] + h @ params["w_hh_t"] + params["bias"]
        i_g = jax.nn.sigmoid(gates[:, 0 * H:1 * H])
        f_g = jax.nn.sigmoid(gates[:, 1 * H:2 * H])
        g_g = jnp.tanh(gates[:, 2 * H:3 * H])
        o_g = jax.nn.sigmoid(gates[:, 3 * H:4 * H])
        c = f_g * c + i_g * g_g
        h = o_g * jnp.tanh(c)
    return h @ params["fc_w_t"] + params["fc_b"]


if __name__ == "__main__":
    vocab_size, hidden_dim, output_dim = 16, 32, 16
    batch, seq_len = 8, 8

    key = jax.random.PRNGKey(0)
    k_params, k_x, k_h, k_c = jax.random.split(key, 4)

    params = init_params(k_params, vocab_size, hidden_dim, output_dim)
    x = jax.random.randint(k_x, (batch, seq_len), 0, vocab_size, jnp.int32)

    # PyTorch uses torch.randn for the initial (h, c); here deterministic normals.
    h0 = jax.random.normal(k_h, (batch, hidden_dim), jnp.float32)
    c0 = jax.random.normal(k_c, (batch, hidden_dim), jnp.float32)

    out = template_matching_lstm_forward(x, params, h0, c0)
    out = jax.block_until_ready(out)

    ref = jax.block_until_ready(reference_forward(x, params, h0, c0))
    assert out.shape == (batch, output_dim)
    # Slightly looser tolerance: sigmoid-via-tanh fusion and the hoisted input
    # projection shift rounding by a few ULPs over the 8-step recurrence.
    assert jnp.allclose(out, ref, atol=1e-4, rtol=1e-4), "mismatch vs reference"

    print("KERNEL_OK")
</pallas_src>

<mosaic_0001>
module attributes {stable_mosaic.version = 11 : i64} {
  func.func @lstm_fc_kernel(%arg0: memref<8x8x128xf32, #tpu.memory_space<vmem>>, %arg1: memref<32x128xf32, #tpu.memory_space<vmem>>, %arg2: memref<8x32xf32, #tpu.memory_space<vmem>>, %arg3: memref<8x32xf32, #tpu.memory_space<vmem>>, %arg4: memref<32x16xf32, #tpu.memory_space<vmem>>, %arg5: memref<1x16xf32, #tpu.memory_space<vmem>>, %arg6: memref<8x16xf32, #tpu.memory_space<vmem>>) attributes {dimension_semantics = [], scalar_prefetch = 0 : i64, scratch_operands = 0 : i64, tpu.core_type = #tpu.core_type<tc>} {
    %c0 = arith.constant 0 : index
    %c0_0 = arith.constant 0 : index
    %0 = vector.load %arg1[%c0, %c0_0] : memref<32x128xf32, #tpu.memory_space<vmem>>, vector<32x128xf32>
    %1 = tpu.iota {dimensions = array<i32: 1>} : vector<8x128xi32>
    %c64_i32 = arith.constant 64 : i32
    %2 = vector.broadcast %c64_i32 : i32 to vector<8x128xi32>
    %3 = arith.cmpi sge, %1, %2 : vector<8x128xi32>
    %c96_i32 = arith.constant 96 : i32
    %4 = vector.broadcast %c96_i32 : i32 to vector<8x128xi32>
    %5 = arith.cmpi slt, %1, %4 : vector<8x128xi32>
    %6 = arith.andi %3, %5 : vector<8x128xi1>
    %cst = arith.constant 1.000000e+00 : f32
    %cst_1 = arith.constant 5.000000e-01 : f32
    %7 = vector.broadcast %cst : f32 to vector<8x128xf32>
    %8 = vector.broadcast %cst_1 : f32 to vector<8x128xf32>
    %9 = arith.select %6, %7, %8 : vector<8x128xi1>, vector<8x128xf32>
    %c0_2 = arith.constant 0 : index
    %c0_3 = arith.constant 0 : index
    %10 = vector.load %arg2[%c0_2, %c0_3] : memref<8x32xf32, #tpu.memory_space<vmem>>, vector<8x32xf32>
    %c0_4 = arith.constant 0 : index
    %c0_5 = arith.constant 0 : index
    %11 = vector.load %arg3[%c0_4, %c0_5] : memref<8x32xf32, #tpu.memory_space<vmem>>, vector<8x32xf32>
    %c0_i32 = arith.constant 0 : i32
    %12 = arith.index_cast %c0_i32 : i32 to index
    %c0_6 = arith.constant 0 : index
    %c0_7 = arith.constant 0 : index
    %13 = vector.load %arg0[%12, %c0_6, %c0_7] : memref<8x8x128xf32, #tpu.memory_space<vmem>>, vector<1x8x128xf32>
    %14 = vector.shape_cast %13 : vector<1x8x128xf32> to vector<8x128xf32>
    %cst_8 = arith.constant dense<0.000000e+00> : vector<8x128xf32>
    %15 = tpu.matmul %10, %0, %cst_8 {dimension_numbers = #tpu.dot_dimension_numbers<[1], [0], [0], [1], [0, 0, 1, 1], [], []>} : vector<8x32xf32>, vector<32x128xf32>, vector<8x128xf32> -> vector<8x128xf32>
    %16 = arith.addf %14, %15 : vector<8x128xf32>
    %17 = arith.mulf %16, %9 : vector<8x128xf32>
    %18 = math.tanh %17 : vector<8x128xf32>
    %cst_9 = arith.constant 5.000000e-01 : f32
    %19 = vector.broadcast %cst_9 : f32 to vector<8x128xf32>
    %20 = arith.mulf %19, %18 : vector<8x128xf32>
    %cst_10 = arith.constant 5.000000e-01 : f32
    %21 = vector.broadcast %cst_10 : f32 to vector<8x128xf32>
    %22 = arith.addf %20, %21 : vector<8x128xf32>
    %23 = arith.select %6, %18, %22 : vector<8x128xi1>, vector<8x128xf32>
    %24 = vector.extract_strided_slice %23 {offsets = [0, 0], sizes = [8, 32], strides = [1, 1]} : vector<8x128xf32> to vector<8x32xf32>
    %25 = vector.extract_strided_slice %23 {offsets = [0, 32], sizes = [8, 32], strides = [1, 1]} : vector<8x128xf32> to vector<8x32xf32>
    %26 = vector.extract_strided_slice %23 {offsets = [0, 64], sizes = [8, 32], strides = [1, 1]} : vector<8x128xf32> to vector<8x32xf32>
    %27 = vector.extract_strided_slice %23 {offsets = [0, 96], sizes = [8, 32], strides = [1, 1]} : vector<8x128xf32> to vector<8x32xf32>
    %28 = arith.mulf %25, %11 : vector<8x32xf32>
    %29 = arith.mulf %24, %26 : vector<8x32xf32>
    %30 = arith.addf %28, %29 : vector<8x32xf32>
    %31 = math.tanh %30 : vector<8x32xf32>
    %32 = arith.mulf %27, %31 : vector<8x32xf32>
    %c1_i32 = arith.constant 1 : i32
    %33 = arith.index_cast %c1_i32 : i32 to index
    %c0_11 = arith.constant 0 : index
    %c0_12 = arith.constant 0 : index
    %34 = vector.load %arg0[%33, %c0_11, %c0_12] : memref<8x8x128xf32, #tpu.memory_space<vmem>>, vector<1x8x128xf32>
    %35 = vector.shape_cast %34 : vector<1x8x128xf32> to vector<8x128xf32>
    %cst_13 = arith.constant dense<0.000000e+00> : vector<8x128xf32>
    %36 = tpu.matmul %32, %0, %cst_13 {dimension_numbers = #tpu.dot_dimension_numbers<[1], [0], [0], [1], [0, 0, 1, 1], [], []>} : vector<8x32xf32>, vector<32x128xf32>, vector<8x128xf32> -> vector<8x128xf32>
    %37 = arith.addf %35, %36 : vector<8x128xf32>
    %38 = arith.mulf %37, %9 : vector<8x128xf32>
    %39 = math.tanh %38 : vector<8x128xf32>
    %cst_14 = arith.constant 5.000000e-01 : f32
    %40 = vector.broadcast %cst_14 : f32 to vector<8x128xf32>
    %41 = arith.mulf %40, %39 : vector<8x128xf32>
    %cst_15 = arith.constant 5.000000e-01 : f32
    %42 = vector.broadcast %cst_15 : f32 to vector<8x128xf32>
    %43 = arith.addf %41, %42 : vector<8x128xf32>
    %44 = arith.select %6, %39, %43 : vector<8x128xi1>, vector<8x128xf32>
    %45 = vector.extract_strided_slice %44 {offsets = [0, 0], sizes = [8, 32], strides = [1, 1]} : vector<8x128xf32> to vector<8x32xf32>
    %46 = vector.extract_strided_slice %44 {offsets = [0, 32], sizes = [8, 32], strides = [1, 1]} : vector<8x128xf32> to vector<8x32xf32>
    %47 = vector.extract_strided_slice %44 {offsets = [0, 64], sizes = [8, 32], strides = [1, 1]} : vector<8x128xf32> to vector<8x32xf32>
    %48 = vector.extract_strided_slice %44 {offsets = [0, 96], sizes = [8, 32], strides = [1, 1]} : vector<8x128xf32> to vector<8x32xf32>
    %49 = arith.mulf %46, %30 : vector<8x32xf32>
    %50 = arith.mulf %45, %47 : vector<8x32xf32>
    %51 = arith.addf %49, %50 : vector<8x32xf32>
    %52 = math.tanh %51 : vector<8x32xf32>
    %53 = arith.mulf %48, %52 : vector<8x32xf32>
    %c2_i32 = arith.constant 2 : i32
    %54 = arith.index_cast %c2_i32 : i32 to index
    %c0_16 = arith.constant 0 : index
    %c0_17 = arith.constant 0 : index
    %55 = vector.load %arg0[%54, %c0_16, %c0_17] : memref<8x8x128xf32, #tpu.memory_space<vmem>>, vector<1x8x128xf32>
    %56 = vector.shape_cast %55 : vector<1x8x128xf32> to vector<8x128xf32>
    %cst_18 = arith.constant dense<0.000000e+00> : vector<8x128xf32>
    %57 = tpu.matmul %53, %0, %cst_18 {dimension_numbers = #tpu.dot_dimension_numbers<[1], [0], [0], [1], [0, 0, 1, 1], [], []>} : vector<8x32xf32>, vector<32x128xf32>, vector<8x128xf32> -> vector<8x128xf32>
    %58 = arith.addf %56, %57 : vector<8x128xf32>
    %59 = arith.mulf %58, %9 : vector<8x128xf32>
    %60 = math.tanh %59 : vector<8x128xf32>
    %cst_19 = arith.constant 5.000000e-01 : f32
    %61 = vector.broadcast %cst_19 : f32 to vector<8x128xf32>
    %62 = arith.mulf %61, %60 : vector<8x128xf32>
    %cst_20 = arith.constant 5.000000e-01 : f32
    %63 = vector.broadcast %cst_20 : f32 to vector<8x128xf32>
    %64 = arith.addf %62, %63 : vector<8x128xf32>
    %65 = arith.select %6, %60, %64 : vector<8x128xi1>, vector<8x128xf32>
    %66 = vector.extract_strided_slice %65 {offsets = [0, 0], sizes = [8, 32], strides = [1, 1]} : vector<8x128xf32> to vector<8x32xf32>
    %67 = vector.extract_strided_slice %65 {offsets = [0, 32], sizes = [8, 32], strides = [1, 1]} : vector<8x128xf32> to vector<8x32xf32>
    %68 = vector.extract_strided_slice %65 {offsets = [0, 64], sizes = [8, 32], strides = [1, 1]} : vector<8x128xf32> to vector<8x32xf32>
    %69 = vector.extract_strided_slice %65 {offsets = [0, 96], sizes = [8, 32], strides = [1, 1]} : vector<8x128xf32> to vector<8x32xf32>
    %70 = arith.mulf %67, %51 : vector<8x32xf32>
    %71 = arith.mulf %66, %68 : vector<8x32xf32>
    %72 = arith.addf %70, %71 : vector<8x32xf32>
    %73 = math.tanh %72 : vector<8x32xf32>
    %74 = arith.mulf %69, %73 : vector<8x32xf32>
    %c3_i32 = arith.constant 3 : i32
    %75 = arith.index_cast %c3_i32 : i32 to index
    %c0_21 = arith.constant 0 : index
    %c0_22 = arith.constant 0 : index
    %76 = vector.load %arg0[%75, %c0_21, %c0_22] : memref<8x8x128xf32, #tpu.memory_space<vmem>>, vector<1x8x128xf32>
    %77 = vector.shape_cast %76 : vector<1x8x128xf32> to vector<8x128xf32>
    %cst_23 = arith.constant dense<0.000000e+00> : vector<8x128xf32>
    %78 = tpu.matmul %74, %0, %cst_23 {dimension_numbers = #tpu.dot_dimension_numbers<[1], [0], [0], [1], [0, 0, 1, 1], [], []>} : vector<8x32xf32>, vector<32x128xf32>, vector<8x128xf32> -> vector<8x128xf32>
    %79 = arith.addf %77, %78 : vector<8x128xf32>
    %80 = arith.mulf %79, %9 : vector<8x128xf32>
    %81 = math.tanh %80 : vector<8x128xf32>
    %cst_24 = arith.constant 5.000000e-01 : f32
    %82 = vector.broadcast %cst_24 : f32 to vector<8x128xf32>
    %83 = arith.mulf %82, %81 : vector<8x128xf32>
    %cst_25 = arith.constant 5.000000e-01 : f32
    %84 = vector.broadcast %cst_25 : f32 to vector<8x128xf32>
    %85 = arith.addf %83, %84 : vector<8x128xf32>
    %86 = arith.select %6, %81, %85 : vector<8x128xi1>, vector<8x128xf32>
    %87 = vector.extract_strided_slice %86 {offsets = [0, 0], sizes = [8, 32], strides = [1, 1]} : vector<8x128xf32> to vector<8x32xf32>
    %88 = vector.extract_strided_slice %86 {offsets = [0, 32], sizes = [8, 32], strides = [1, 1]} : vector<8x128xf32> to vector<8x32xf32>
    %89 = vector.extract_strided_slice %86 {offsets = [0, 64], sizes = [8, 32], strides = [1, 1]} : vector<8x128xf32> to vector<8x32xf32>
    %90 = vector.extract_strided_slice %86 {offsets = [0, 96], sizes = [8, 32], strides = [1, 1]} : vector<8x128xf32> to vector<8x32xf32>
    %91 = arith.mulf %88, %72 : vector<8x32xf32>
    %92 = arith.mulf %87, %89 : vector<8x32xf32>
    %93 = arith.addf %91, %92 : vector<8x32xf32>
    %94 = math.tanh %93 : vector<8x32xf32>
    %95 = arith.mulf %90, %94 : vector<8x32xf32>
    %c4_i32 = arith.constant 4 : i32
    %96 = arith.index_cast %c4_i32 : i32 to index
    %c0_26 = arith.constant 0 : index
    %c0_27 = arith.constant 0 : index
    %97 = vector.load %arg0[%96, %c0_26, %c0_27] : memref<8x8x128xf32, #tpu.memory_space<vmem>>, vector<1x8x128xf32>
    %98 = vector.shape_cast %97 : vector<1x8x128xf32> to vector<8x128xf32>
    %cst_28 = arith.constant dense<0.000000e+00> : vector<8x128xf32>
    %99 = tpu.matmul %95, %0, %cst_28 {dimension_numbers = #tpu.dot_dimension_numbers<[1], [0], [0], [1], [0, 0, 1, 1], [], []>} : vector<8x32xf32>, vector<32x128xf32>, vector<8x128xf32> -> vector<8x128xf32>
    %100 = arith.addf %98, %99 : vector<8x128xf32>
    %101 = arith.mulf %100, %9 : vector<8x128xf32>
    %102 = math.tanh %101 : vector<8x128xf32>
    %cst_29 = arith.constant 5.000000e-01 : f32
    %103 = vector.broadcast %cst_29 : f32 to vector<8x128xf32>
    %104 = arith.mulf %103, %102 : vector<8x128xf32>
    %cst_30 = arith.constant 5.000000e-01 : f32
    %105 = vector.broadcast %cst_30 : f32 to vector<8x128xf32>
    %106 = arith.addf %104, %105 : vector<8x128xf32>
    %107 = arith.select %6, %102, %106 : vector<8x128xi1>, vector<8x128xf32>
    %108 = vector.extract_strided_slice %107 {offsets = [0, 0], sizes = [8, 32], strides = [1, 1]} : vector<8x128xf32> to vector<8x32xf32>
    %109 = vector.extract_strided_slice %107 {offsets = [0, 32], sizes = [8, 32], strides = [1, 1]} : vector<8x128xf32> to vector<8x32xf32>
    %110 = vector.extract_strided_slice %107 {offsets = [0, 64], sizes = [8, 32], strides = [1, 1]} : vector<8x128xf32> to vector<8x32xf32>
    %111 = vector.extract_strided_slice %107 {offsets = [0, 96], sizes = [8, 32], strides = [1, 1]} : vector<8x128xf32> to vector<8x32xf32>
    %112 = arith.mulf %109, %93 : vector<8x32xf32>
    %113 = arith.mulf %108, %110 : vector<8x32xf32>
    %114 = arith.addf %112, %113 : vector<8x32xf32>
    %115 = math.tanh %114 : vector<8x32xf32>
    %116 = arith.mulf %111, %115 : vector<8x32xf32>
    %c5_i32 = arith.constant 5 : i32
    %117 = arith.index_cast %c5_i32 : i32 to index
    %c0_31 = arith.constant 0 : index
    %c0_32 = arith.constant 0 : index
    %118 = vector.load %arg0[%117, %c0_31, %c0_32] : memref<8x8x128xf32, #tpu.memory_space<vmem>>, vector<1x8x128xf32>
    %119 = vector.shape_cast %118 : vector<1x8x128xf32> to vector<8x128xf32>
    %cst_33 = arith.constant dense<0.000000e+00> : vector<8x128xf32>
    %120 = tpu.matmul %116, %0, %cst_33 {dimension_numbers = #tpu.dot_dimension_numbers<[1], [0], [0], [1], [0, 0, 1, 1], [], []>} : vector<8x32xf32>, vector<32x128xf32>, vector<8x128xf32> -> vector<8x128xf32>
    %121 = arith.addf %119, %120 : vector<8x128xf32>
    %122 = arith.mulf %121, %9 : vector<8x128xf32>
    %123 = math.tanh %122 : vector<8x128xf32>
    %cst_34 = arith.constant 5.000000e-01 : f32
    %124 = vector.broadcast %cst_34 : f32 to vector<8x128xf32>
    %125 = arith.mulf %124, %123 : vector<8x128xf32>
    %cst_35 = arith.constant 5.000000e-01 : f32
    %126 = vector.broadcast %cst_35 : f32 to vector<8x128xf32>
    %127 = arith.addf %125, %126 : vector<8x128xf32>
    %128 = arith.select %6, %123, %127 : vector<8x128xi1>, vector<8x128xf32>
    %129 = vector.extract_strided_slice %128 {offsets = [0, 0], sizes = [8, 32], strides = [1, 1]} : vector<8x128xf32> to vector<8x32xf32>
    %130 = vector.extract_strided_slice %128 {offsets = [0, 32], sizes = [8, 32], strides = [1, 1]} : vector<8x128xf32> to vector<8x32xf32>
    %131 = vector.extract_strided_slice %128 {offsets = [0, 64], sizes = [8, 32], strides = [1, 1]} : vector<8x128xf32> to vector<8x32xf32>
    %132 = vector.extract_strided_slice %128 {offsets = [0, 96], sizes = [8, 32], strides = [1, 1]} : vector<8x128xf32> to vector<8x32xf32>
    %133 = arith.mulf %130, %114 : vector<8x32xf32>
    %134 = arith.mulf %129, %131 : vector<8x32xf32>
    %135 = arith.addf %133, %134 : vector<8x32xf32>
    %136 = math.tanh %135 : vector<8x32xf32>
    %137 = arith.mulf %132, %136 : vector<8x32xf32>
    %c6_i32 = arith.constant 6 : i32
    %138 = arith.index_cast %c6_i32 : i32 to index
    %c0_36 = arith.constant 0 : index
    %c0_37 = arith.constant 0 : index
    %139 = vector.load %arg0[%138, %c0_36, %c0_37] : memref<8x8x128xf32, #tpu.memory_space<vmem>>, vector<1x8x128xf32>
    %140 = vector.shape_cast %139 : vector<1x8x128xf32> to vector<8x128xf32>
    %cst_38 = arith.constant dense<0.000000e+00> : vector<8x128xf32>
    %141 = tpu.matmul %137, %0, %cst_38 {dimension_numbers = #tpu.dot_dimension_numbers<[1], [0], [0], [1], [0, 0, 1, 1], [], []>} : vector<8x32xf32>, vector<32x128xf32>, vector<8x128xf32> -> vector<8x128xf32>
    %142 = arith.addf %140, %141 : vector<8x128xf32>
    %143 = arith.mulf %142, %9 : vector<8x128xf32>
    %144 = math.tanh %143 : vector<8x128xf32>
    %cst_39 = arith.constant 5.000000e-01 : f32
    %145 = vector.broadcast %cst_39 : f32 to vector<8x128xf32>
    %146 = arith.mulf %145, %144 : vector<8x128xf32>
    %cst_40 = arith.constant 5.000000e-01 : f32
    %147 = vector.broadcast %cst_40 : f32 to vector<8x128xf32>
    %148 = arith.addf %146, %147 : vector<8x128xf32>
    %149 = arith.select %6, %144, %148 : vector<8x128xi1>, vector<8x128xf32>
    %150 = vector.extract_strided_slice %149 {offsets = [0, 0], sizes = [8, 32], strides = [1, 1]} : vector<8x128xf32> to vector<8x32xf32>
    %151 = vector.extract_strided_slice %149 {offsets = [0, 32], sizes = [8, 32], strides = [1, 1]} : vector<8x128xf32> to vector<8x32xf32>
    %152 = vector.extract_strided_slice %149 {offsets = [0, 64], sizes = [8, 32], strides = [1, 1]} : vector<8x128xf32> to vector<8x32xf32>
    %153 = vector.extract_strided_slice %149 {offsets = [0, 96], sizes = [8, 32], strides = [1, 1]} : vector<8x128xf32> to vector<8x32xf32>
    %154 = arith.mulf %151, %135 : vector<8x32xf32>
    %155 = arith.mulf %150, %152 : vector<8x32xf32>
    %156 = arith.addf %154, %155 : vector<8x32xf32>
    %157 = math.tanh %156 : vector<8x32xf32>
    %158 = arith.mulf %153, %157 : vector<8x32xf32>
    %c7_i32 = arith.constant 7 : i32
    %159 = arith.index_cast %c7_i32 : i32 to index
    %c0_41 = arith.constant 0 : index
    %c0_42 = arith.constant 0 : index
    %160 = vector.load %arg0[%159, %c0_41, %c0_42] : memref<8x8x128xf32, #tpu.memory_space<vmem>>, vector<1x8x128xf32>
    %161 = vector.shape_cast %160 : vector<1x8x128xf32> to vector<8x128xf32>
    %cst_43 = arith.constant dense<0.000000e+00> : vector<8x128xf32>
    %162 = tpu.matmul %158, %0, %cst_43 {dimension_numbers = #tpu.dot_dimension_numbers<[1], [0], [0], [1], [0, 0, 1, 1], [], []>} : vector<8x32xf32>, vector<32x128xf32>, vector<8x128xf32> -> vector<8x128xf32>
    %163 = arith.addf %161, %162 : vector<8x128xf32>
    %164 = arith.mulf %163, %9 : vector<8x128xf32>
    %165 = math.tanh %164 : vector<8x128xf32>
    %cst_44 = arith.constant 5.000000e-01 : f32
    %166 = vector.broadcast %cst_44 : f32 to vector<8x128xf32>
    %167 = arith.mulf %166, %165 : vector<8x128xf32>
    %cst_45 = arith.constant 5.000000e-01 : f32
    %168 = vector.broadcast %cst_45 : f32 to vector<8x128xf32>
    %169 = arith.addf %167, %168 : vector<8x128xf32>
    %170 = arith.select %6, %165, %169 : vector<8x128xi1>, vector<8x128xf32>
    %171 = vector.extract_strided_slice %170 {offsets = [0, 0], sizes = [8, 32], strides = [1, 1]} : vector<8x128xf32> to vector<8x32xf32>
    %172 = vector.extract_strided_slice %170 {offsets = [0, 32], sizes = [8, 32], strides = [1, 1]} : vector<8x128xf32> to vector<8x32xf32>
    %173 = vector.extract_strided_slice %170 {offsets = [0, 64], sizes = [8, 32], strides = [1, 1]} : vector<8x128xf32> to vector<8x32xf32>
    %174 = vector.extract_strided_slice %170 {offsets = [0, 96], sizes = [8, 32], strides = [1, 1]} : vector<8x128xf32> to vector<8x32xf32>
    %175 = arith.mulf %172, %156 : vector<8x32xf32>
    %176 = arith.mulf %171, %173 : vector<8x32xf32>
    %177 = arith.addf %175, %176 : vector<8x32xf32>
    %178 = math.tanh %177 : vector<8x32xf32>
    %179 = arith.mulf %174, %178 : vector<8x32xf32>
    %c8_i32 = arith.constant 8 : i32
    %c0_46 = arith.constant 0 : index
    %c0_47 = arith.constant 0 : index
    %180 = vector.load %arg4[%c0_46, %c0_47] : memref<32x16xf32, #tpu.memory_space<vmem>>, vector<32x16xf32>
    %cst_48 = arith.constant dense<0.000000e+00> : vector<8x16xf32>
    %181 = tpu.matmul %179, %180, %cst_48 {dimension_numbers = #tpu.dot_dimension_numbers<[1], [0], [0], [1], [0, 0, 1, 1], [], []>} : vector<8x32xf32>, vector<32x16xf32>, vector<8x16xf32> -> vector<8x16xf32>
    %c0_49 = arith.constant 0 : index
    %c0_50 = arith.constant 0 : index
    %182 = vector.load %arg5[%c0_49, %c0_50] : memref<1x16xf32, #tpu.memory_space<vmem>>, vector<1x16xf32>
    %183 = vector.broadcast %182 : vector<1x16xf32> to vector<8x16xf32>
    %184 = arith.addf %181, %183 : vector<8x16xf32>
    %c0_51 = arith.constant 0 : index
    %c0_52 = arith.constant 0 : index
    %185 = vector.load %arg6[%c0_51, %c0_52] : memref<8x16xf32, #tpu.memory_space<vmem>>, vector<8x16xf32>
    tpu.vector_store %arg6[%c0_51, %c0_52], %184 {strides = array<i32>} : memref<8x16xf32, #tpu.memory_space<vmem>>, vector<8x16xf32>,
    return
  }
}

</mosaic_0001>

<bundles_post_ra>
// kernel: tpu_custom_call.1
= control target key start
LH: loop header
LB: loop body
LE: loop exit
PB: predicated region body
PF: predicated region fallthrough
CT: control target
= control target key end

     0   :  { %11 = vsyncpa [#allocation3], 0  ;;  %s1485_s0 = inlined_call_operand.hbm [shape: f32[8,8,128], index: 0, kind: input, shape index: {}]   ;;  %s1486_s1 = inlined_call_operand.vmem [shape: f32[32,128], index: 1, kind: input, shape index: {}]   ;;  %s1487_s2 = inlined_call_operand.vmem [shape: f32[8,32], index: 2, kind: input, shape index: {}]   ;;  %s1488_s3 = inlined_call_operand.vmem [shape: f32[8,32], index: 3, kind: input, shape index: {}]   ;;  %s1489_s4 = inlined_call_operand.vmem [shape: f32[32,16], index: 4, kind: input, shape index: {}]   ;;  %s1490_s5 = inlined_call_operand.vmem [shape: f32[1,16], index: 5, kind: input, shape index: {}]   ;;  %s1491_s6 = inlined_call_operand.hbm [shape: f32[8,16], index: 6, kind: output, shape index: {}]  }
   0x1   :  { %12 = vsyncpa [#allocation4], 0  ;;  %s1253_s21 = smov [#allocation2]   ;;  %s1205_s25 = scalar_lea.hbm %s1485_s0, 1024 }
   0x2   :  { %s18_s22 = sshll.u32 %s1253_s21, 4  ;;  %p1206_p0 = scmp.ne.s32.totalorder %s1485_s0, %s1205_s25  ;;  %s19_s22 = int_to_ptr.vmem [resolvable:$true] %s18_s22 }
   0x3   :  { %p1209_p1 = scmp.lt.u32.totalorder %s1205_s25, %s1485_s0 }
   0x5   :  { %p1211_p2 = pnand %p1209_p1, %p1206_p0 }
   0x7   :  { %1214 = shalt.err (!%p1211_p2)
}
   0x8   :  { %s1215_s30 = scalar_lea.vmem %s19_s22, 1024  ;;  %p1220_p4 = scmp.lt.s32.totalorder %s19_s22, %s19_s22 }
   0x9   :  { %p1216_p3 = scmp.ne.s32.totalorder %s19_s22, %s1215_s30  ;;  %p1221_p5 = scmp.lt.s32.totalorder %s1215_s30, %s1215_s30 }
   0xb   :  { %p1222_p6 = por %p1221_p5, %p1220_p4 }
   0xd   :  { %p1223_p7 = pnand %p1222_p6, %p1216_p3 }
   0xf   :  { %1226 = shalt.err (!%p1223_p7)
}
  0x10   :  { %s1254_s7 = smov 128   ;;  %s1255_s8 = smov 8  }
  0x11   :  { %24 = dma.hbm_to_vmem [thread:$0]  %s1485_s0, 1024, %s19_s22, [#allocation3], %s1254_s7, %s1254_s7, %s1255_s8  }
  0x12   :  { %1249 = dma.done.wait [#allocation3], 1024  }
  0x13   :  { %1250 = vsyncadd [#allocation3], 4294966272  ;;  %v1256_v0 = vmov 0.0|0.0   ;;  %vm1257_vm0 = vmmov 0   ;;  %v1258_v1 = vmov 0.0   ;;  %v38_v2 = vld [vmem:[%s1486_s1] sm:$0xff]  ;;  %v42_v9 = vlaneseq }
  0x14   :  { %1109 = vmatprep.subr.bf16.mxu0 %v1256_v0  ;;  %1018 = vmatprep.mubr.msk.f32.mxu0 %vm1257_vm0, %v1258_v1  ;;  %v39_v3 = vld [vmem:[%s1486_s1 + $0x8] sm:$0xff]  ;;  %v40_v4 = vld [vmem:[%s1486_s1 + $0x10] sm:$0xff]  ;;  %v41_v6 = vld [vmem:[%s1486_s1 + $0x18] sm:$0xff]  ;;  %vm51_vm1 = vcmask 261120   ;;  %v1259_v13 = vmov 0.5   ;;  %s1260_s1 = smov 64  }
  0x15   :  { %1115 = vmatprep.subr.bf16.mxu1 %v1256_v0  ;;  %1029 = vmatprep.mubr.msk.f32.mxu1 %vm1257_vm0, %v1258_v1  ;;  %v1325_v5 = vpack.c.bf16 %v39_v3, %v38_v2  ;;  %v1331_v7 = vpack.c.bf16 %v41_v6, %v40_v4  ;;  %v48_v8 = vld [vmem:[%s1487_s2] sm:$0xff]  ;;  %v43_v10 = vand.u32 127, %v42_v9  ;;  %s1261_s21 = smov 32   ;;  %v153_v34 = vld [vmem:[#allocation2 + $0x8] sm:$0xff]  ;;  %v253_v52 = vld [vmem:[#allocation2 + $0x10] sm:$0xff]  ;;  %vm938_vm5 = vcmask 130048  }
  0x16   :  { %v50_v12 = vld [vmem:[#allocation2] sm:$0xff]  ;;  %v854_v11 = vld [vmem:[%s1489_s4 + $0x10] sm:$0xff] }
  0x17   :  { %1111 = vmatpush3.bf16.msra.mxu0 %v1325_v5  ;;  %1117 = vmatpush3.bf16.msra.mxu1 %v1325_v5  ;;  %vm44_vm2 = vcmp.ge.s32.totalorder %v43_v10, 64  ;;  %vm45_vm3 = vcmp.lt.s32.totalorder %v43_v10, 96  ;;  %v49_v23 = vld [vmem:[%s1488_s3] sm:$0xff]  ;;  %v353_v10 = vld [vmem:[#allocation2 + $0x18] sm:$0xff] }
  0x18   :  { %1112 = vmatprep.subr.bf16.mxu0 %v1256_v0  ;;  %1118 = vmatprep.subr.bf16.mxu1 %v1256_v0  ;;  %vm1350_vm4 = vmand %vm44_vm2, %vm45_vm3 }
  0x19   :  { %v1356_v14 = vsel %vm1350_vm4, 1.0, %v1259_v13 }
  0x1b   :  { %1114 = vmatpush3.bf16.msra.mxu0 %v1331_v7  ;;  %1120 = vmatpush3.bf16.msra.mxu1 %v1331_v7 }
  0x1c   :  { %1121 = vmatprep.subr.bf16.mxu0 %v1256_v0  ;;  %1127 = vmatprep.subr.bf16.mxu1 %v1256_v0 }
  0x1e   :  { %1019 = vmatmul.mubr.msk.f32.vlgmr.msra.gmra.mrb[0].mxu0 %vm51_vm1, %v48_v8 }
  0x1f   :  { %1123 = vmatpush3.bf16.msra.mxu0 %v1325_v5  ;;  %1040 = vmatprep.mubr.msk.f32.mxu0 %vm1257_vm0, %v1258_v1 }
  0x20   :  { %1124 = vmatprep.subr.bf16.mxu0 %v1256_v0 }
  0x23   :  { %1126 = vmatpush3.bf16.msra.mxu0 %v1331_v7 }
  0x24   :  { %1133 = vmatprep.subr.bf16.mxu0 %v1256_v0 }
  0xf1   :  { %v121_v15 = vpop.f32.mrb[0].mxu0 }
  0xf2   :  { %v125_v16 = vadd.f32 %v121_v15, %v50_v12  ;;  %v1020_v17 = vpop.f32.mrb[1].mxu0 }
  0xf4   :  { %v126_v18 = vmul.f32 %v125_v16, %v1356_v14 }
  0xf6   :  { %1173 = vtanh.f32 %v126_v18 }
 0x100   :  { %v1174_v19 = vpop.eup %1173 }
 0x101   :  { %v128_v20 = vmul.f32 0.5, %v1174_v19 }
 0x103   :  { %v129_v21 = vadd.f32 0.5, %v128_v20 }
 0x105   :  { %v130_v22 = vsel %vm1350_vm4, %v1174_v19, %v129_v21 }
 0x106   :  { %137 = vrot.lane.b32.xlu0 %v130_v22, %s1260_s1 }
 0x10a   :  { %132 = vrot.lane.b32.xlu0 %v49_v23, %s1261_s21 }
 0x178   :  { %v138_v24 = vpop.permute.xlu0 %137 }
 0x179   :  { %v140_v25 = vmul.f32 %v138_v24, %v130_v22 }
 0x17b   :  { %142 = vrot.lane.b32.xlu1 %v140_v25, %s1261_s21 }
 0x17c   :  { %v133_v26 = vpop.permute.xlu0 %132 }
 0x17d   :  { %v135_v27 = vmul.f32 %v133_v26, %v130_v22 }
 0x1ed   :  { %v143_v28 = vpop.permute.xlu1 %142 }
 0x1ee   :  { %v145_v29 = vadd.f32 %v143_v28, %v135_v27 }
 0x1f0   :  { %1175 = vtanh.f32 %v145_v29 }
 0x1fa   :  { %v1176_v30 = vpop.eup %1175 }
 0x1fb   :  { %148 = vrot.lane.b32.xlu1 %v1176_v30, %s1260_s1  ;;  %v453_v30 = vld [vmem:[#allocation2 + $0x20] sm:$0xff] }
 0x26d   :  { %v149_v31 = vpop.permute.xlu1 %148 }
 0x26e   :  { %v151_v32 = vmul.f32 %v149_v31, %v130_v22 }
 0x270   :  { %155 = vrot.lane.b32.xlu0 %v151_v32, %s1261_s21 }
 0x2e2   :  { %v156_v33 = vpop.permute.xlu0 %155 }
 0x2e3   :  { %1030 = vmatmul.mubr.msk.f32.vlgmr.msra.gmra.mrb[0].mxu1 %vm51_vm1, %v156_v33 }
 0x2e4   :  { %1129 = vmatpush3.bf16.msra.mxu1 %v1325_v5  ;;  %1051 = vmatprep.mubr.msk.f32.mxu1 %vm1257_vm0, %v1258_v1 }
 0x2e5   :  { %1130 = vmatprep.subr.bf16.mxu1 %v1256_v0 }
 0x2e8   :  { %1132 = vmatpush3.bf16.msra.mxu1 %v1331_v7 }
 0x2e9   :  { %1139 = vmatprep.subr.bf16.mxu1 %v1256_v0 }
 0x3b6   :  { %v225_v35 = vpop.f32.mrb[0].mxu1 }
 0x3b7   :  { %v229_v36 = vadd.f32 %v225_v35, %v153_v34  ;;  %v1031_v37 = vpop.f32.mrb[1].mxu1 }
 0x3b9   :  { %v230_v38 = vmul.f32 %v229_v36, %v1356_v14 }
 0x3bb   :  { %1177 = vtanh.f32 %v230_v38 }
 0x3c5   :  { %v1178_v39 = vpop.eup %1177 }
 0x3c6   :  { %v232_v40 = vmul.f32 0.5, %v1178_v39 }
 0x3c8   :  { %v233_v41 = vadd.f32 0.5, %v232_v40 }
 0x3ca   :  { %v234_v42 = vsel %vm1350_vm4, %v1178_v39, %v233_v41 }
 0x3cb   :  { %237 = vrot.lane.b32.xlu1 %v234_v42, %s1260_s1  ;;  %v235_v45 = vmul.f32 %v234_v42, %v145_v29 }
 0x43d   :  { %v238_v43 = vpop.permute.xlu1 %237 }
 0x43e   :  { %v240_v44 = vmul.f32 %v238_v43, %v234_v42 }
 0x440   :  { %242 = vrot.lane.b32.xlu0 %v240_v44, %s1261_s21 }
 0x4b2   :  { %v243_v46 = vpop.permute.xlu0 %242 }
 0x4b3   :  { %v245_v47 = vadd.f32 %v243_v46, %v235_v45 }
 0x4b5   :  { %1179 = vtanh.f32 %v245_v47 }
 0x4bf   :  { %v1180_v48 = vpop.eup %1179 }
 0x4c0   :  { %248 = vrot.lane.b32.xlu1 %v1180_v48, %s1260_s1  ;;  %v553_v48 = vld [vmem:[#allocation2 + $0x28] sm:$0xff] }
 0x532   :  { %v249_v49 = vpop.permute.xlu1 %248 }
 0x533   :  { %v251_v50 = vmul.f32 %v249_v49, %v234_v42 }
 0x535   :  { %255 = vrot.lane.b32.xlu0 %v251_v50, %s1261_s21 }
 0x5a7   :  { %v256_v51 = vpop.permute.xlu0 %255 }
 0x5a8   :  { %1041 = vmatmul.mubr.msk.f32.vlgmr.msra.gmra.mrb[2].mxu0 %vm51_vm1, %v256_v51 }
 0x5a9   :  { %1135 = vmatpush3.bf16.msra.mxu0 %v1325_v5  ;;  %1062 = vmatprep.mubr.msk.f32.mxu0 %vm1257_vm0, %v1258_v1 }
 0x5aa   :  { %1136 = vmatprep.subr.bf16.mxu0 %v1256_v0 }
 0x5ad   :  { %1138 = vmatpush3.bf16.msra.mxu0 %v1331_v7 }
 0x5ae   :  { %1145 = vmatprep.subr.bf16.mxu0 %v1256_v0 }
 0x67b   :  { %v325_v53 = vpop.f32.mrb[2].mxu0 }
 0x67c   :  { %v329_v54 = vadd.f32 %v325_v53, %v253_v52  ;;  %v1042_v55 = vpop.f32.mrb[3].mxu0 }
 0x67e   :  { %v330_v56 = vmul.f32 %v329_v54, %v1356_v14 }
 0x680   :  { %1181 = vtanh.f32 %v330_v56 }
 0x68a   :  { %v1182_v57 = vpop.eup %1181 }
 0x68b   :  { %v332_v58 = vmul.f32 0.5, %v1182_v57 }
 0x68d   :  { %v333_v59 = vadd.f32 0.5, %v332_v58 }
 0x68f   :  { %v334_v60 = vsel %vm1350_vm4, %v1182_v57, %v333_v59 }
 0x690   :  { %337 = vrot.lane.b32.xlu1 %v334_v60, %s1260_s1  ;;  %v335_v63 = vmul.f32 %v334_v60, %v245_v47 }
 0x702   :  { %v338_v61 = vpop.permute.xlu1 %337 }
 0x703   :  { %v340_v62 = vmul.f32 %v338_v61, %v334_v60 }
 0x705   :  { %342 = vrot.lane.b32.xlu0 %v340_v62, %s1261_s21 }
 0x777   :  { %v343_v2 = vpop.permute.xlu0 %342 }
 0x778   :  { %v345_v3 = vadd.f32 %v343_v2, %v335_v63  ;;  %v653_v2 = vld [vmem:[#allocation2 + $0x30] sm:$0xff] }
 0x77a   :  { %1183 = vtanh.f32 %v345_v3 }
 0x784   :  { %v1184_v4 = vpop.eup %1183 }
 0x785   :  { %348 = vrot.lane.b32.xlu1 %v1184_v4, %s1260_s1 }
 0x7f7   :  { %v349_v6 = vpop.permute.xlu1 %348 }
 0x7f8   :  { %v351_v8 = vmul.f32 %v349_v6, %v334_v60 }
 0x7fa   :  { %355 = vrot.lane.b32.xlu0 %v351_v8, %s1261_s21 }
 0x86c   :  { %v356_v9 = vpop.permute.xlu0 %355 }
 0x86d   :  { %1052 = vmatmul.mubr.msk.f32.vlgmr.msra.gmra.mrb[2].mxu1 %vm51_vm1, %v356_v9 }
 0x86e   :  { %1141 = vmatpush3.bf16.msra.mxu1 %v1325_v5  ;;  %1073 = vmatprep.mubr.msk.f32.mxu1 %vm1257_vm0, %v1258_v1 }
 0x86f   :  { %1142 = vmatprep.subr.bf16.mxu1 %v1256_v0 }
 0x872   :  { %1144 = vmatpush3.bf16.msra.mxu1 %v1331_v7 }
 0x873   :  { %1151 = vmatprep.subr.bf16.mxu1 %v1256_v0 }
 0x940   :  { %v425_v12 = vpop.f32.mrb[2].mxu1 }
 0x941   :  { %v429_v13 = vadd.f32 %v425_v12, %v353_v10  ;;  %v1053_v15 = vpop.f32.mrb[3].mxu1 }
 0x943   :  { %v430_v16 = vmul.f32 %v429_v13, %v1356_v14 }
 0x945   :  { %1185 = vtanh.f32 %v430_v16 }
 0x94f   :  { %v1186_v17 = vpop.eup %1185 }
 0x950   :  { %v432_v18 = vmul.f32 0.5, %v1186_v17 }
 0x952   :  { %v433_v19 = vadd.f32 0.5, %v432_v18 }
 0x954   :  { %v434_v20 = vsel %vm1350_vm4, %v1186_v17, %v433_v19 }
 0x955   :  { %437 = vrot.lane.b32.xlu1 %v434_v20, %s1260_s1  ;;  %v435_v23 = vmul.f32 %v434_v20, %v345_v3 }
 0x9c7   :  { %v438_v21 = vpop.permute.xlu1 %437 }
 0x9c8   :  { %v440_v22 = vmul.f32 %v438_v21, %v434_v20 }
 0x9ca   :  { %442 = vrot.lane.b32.xlu0 %v440_v22, %s1261_s21 }
 0xa3c   :  { %v443_v24 = vpop.permute.xlu0 %442 }
 0xa3d   :  { %v445_v25 = vadd.f32 %v443_v24, %v435_v23  ;;  %v753_v23 = vld [vmem:[#allocation2 + $0x38] sm:$0xff] }
 0xa3f   :  { %1187 = vtanh.f32 %v445_v25 }
 0xa49   :  { %v1188_v26 = vpop.eup %1187 }
 0xa4a   :  { %448 = vrot.lane.b32.xlu1 %v1188_v26, %s1260_s1 }
 0xabc   :  { %v449_v27 = vpop.permute.xlu1 %448 }
 0xabd   :  { %v451_v28 = vmul.f32 %v449_v27, %v434_v20 }
 0xabf   :  { %455 = vrot.lane.b32.xlu0 %v451_v28, %s1261_s21 }
 0xb31   :  { %v456_v29 = vpop.permute.xlu0 %455 }
 0xb32   :  { %1063 = vmatmul.mubr.msk.f32.vlgmr.msra.gmra.mrb[4].mxu0 %vm51_vm1, %v456_v29 }
 0xb33   :  { %1147 = vmatpush3.bf16.msra.mxu0 %v1325_v5  ;;  %1084 = vmatprep.mubr.msk.f32.mxu0 %vm1257_vm0, %v1258_v1 }
 0xb34   :  { %1148 = vmatprep.subr.bf16.mxu0 %v1256_v0 }
 0xb37   :  { %1150 = vmatpush3.bf16.msra.mxu0 %v1331_v7 }
 0xb38   :  { %1157 = vmatprep.subr.bf16.mxu0 %v1256_v0 }
 0xc05   :  { %v525_v31 = vpop.f32.mrb[4].mxu0 }
 0xc06   :  { %v529_v32 = vadd.f32 %v525_v31, %v453_v30  ;;  %v1064_v33 = vpop.f32.mrb[5].mxu0 }
 0xc08   :  { %v530_v34 = vmul.f32 %v529_v32, %v1356_v14 }
 0xc0a   :  { %1189 = vtanh.f32 %v530_v34 }
 0xc14   :  { %v1190_v35 = vpop.eup %1189 }
 0xc15   :  { %v532_v36 = vmul.f32 0.5, %v1190_v35 }
 0xc17   :  { %v533_v37 = vadd.f32 0.5, %v532_v36 }
 0xc19   :  { %v534_v38 = vsel %vm1350_vm4, %v1190_v35, %v533_v37  ;;  %v853_v37 = vld [vmem:[%s1489_s4 + $0x8] sm:$0xff] }
 0xc1a   :  { %537 = vrot.lane.b32.xlu1 %v534_v38, %s1260_s1  ;;  %v535_v41 = vmul.f32 %v534_v38, %v445_v25 }
 0xc8c   :  { %v538_v39 = vpop.permute.xlu1 %537 }
 0xc8d   :  { %v540_v40 = vmul.f32 %v538_v39, %v534_v38  ;;  %v855_v39 = vld [vmem:[%s1489_s4 + $0x18] sm:$0xff] }
 0xc8f   :  { %542 = vrot.lane.b32.xlu0 %v540_v40, %s1261_s21  ;;  %v1161_v40 = vpack.c.bf16 %v855_v39, %v854_v11 }
 0xd01   :  { %v543_v42 = vpop.permute.xlu0 %542 }
 0xd02   :  { %v545_v43 = vadd.f32 %v543_v42, %v535_v41 }
 0xd04   :  { %1191 = vtanh.f32 %v545_v43 }
 0xd0e   :  { %v1192_v44 = vpop.eup %1191 }
 0xd0f   :  { %548 = vrot.lane.b32.xlu1 %v1192_v44, %s1260_s1 }
 0xd81   :  { %v549_v45 = vpop.permute.xlu1 %548 }
 0xd82   :  { %v551_v46 = vmul.f32 %v549_v45, %v534_v38  ;;  %v963_v45 = vld [vmem:[%s1490_s5] ss:$0 sm:$0xff] }
 0xd84   :  { %555 = vrot.lane.b32.xlu0 %v551_v46, %s1261_s21 }
 0xdf6   :  { %v556_v47 = vpop.permute.xlu0 %555 }
 0xdf7   :  { %1074 = vmatmul.mubr.msk.f32.vlgmr.msra.gmra.mrb[4].mxu1 %vm51_vm1, %v556_v47 }
 0xdf8   :  { %1153 = vmatpush3.bf16.msra.mxu1 %v1325_v5  ;;  %1095 = vmatprep.mubr.msk.f32.mxu1 %vm1257_vm0, %v1258_v1 }
 0xdf9   :  { %1154 = vmatprep.subr.bf16.mxu1 %v1256_v0 }
 0xdfc   :  { %1156 = vmatpush3.bf16.msra.mxu1 %v1331_v7 }
 0xeca   :  { %v625_v49 = vpop.f32.mrb[4].mxu1 }
 0xecb   :  { %v629_v50 = vadd.f32 %v625_v49, %v553_v48  ;;  %v1075_v51 = vpop.f32.mrb[5].mxu1 }
 0xecd   :  { %v630_v52 = vmul.f32 %v629_v50, %v1356_v14 }
 0xecf   :  { %1193 = vtanh.f32 %v630_v52 }
 0xed9   :  { %v1194_v53 = vpop.eup %1193 }
 0xeda   :  { %v632_v54 = vmul.f32 0.5, %v1194_v53 }
 0xedc   :  { %v633_v55 = vadd.f32 0.5, %v632_v54 }
 0xede   :  { %v634_v5 = vsel %vm1350_vm4, %v1194_v53, %v633_v55 }
 0xedf   :  { %637 = vrot.lane.b32.xlu1 %v634_v5, %s1260_s1  ;;  %v635_v7 = vmul.f32 %v634_v5, %v545_v43 }
 0xf51   :  { %v638_v56 = vpop.permute.xlu1 %637 }
 0xf52   :  { %v640_v57 = vmul.f32 %v638_v56, %v634_v5 }
 0xf54   :  { %642 = vrot.lane.b32.xlu0 %v640_v57, %s1261_s21 }
 0xfc6   :  { %v643_v58 = vpop.permute.xlu0 %642 }
 0xfc7   :  { %v645_v59 = vadd.f32 %v643_v58, %v635_v7 }
 0xfc9   :  { %1195 = vtanh.f32 %v645_v59 }
 0xfd3   :  { %v1196_v60 = vpop.eup %1195 }
 0xfd4   :  { %648 = vrot.lane.b32.xlu1 %v1196_v60, %s1260_s1 }
0x1046   :  { %v649_v61 = vpop.permute.xlu1 %648 }
0x1047   :  { %v651_v62 = vmul.f32 %v649_v61, %v634_v5 }
0x1049   :  { %655 = vrot.lane.b32.xlu0 %v651_v62, %s1261_s21 }
0x10bb   :  { %v656_v63 = vpop.permute.xlu0 %655 }
0x10bc   :  { %1085 = vmatmul.mubr.msk.f32.vlgmr.msra.gmra.mrb[6].mxu0 %vm51_vm1, %v656_v63 }
0x10bd   :  { %1106 = vmatprep.mubr.msk.f32.mxu0 %vm1257_vm0, %v1258_v1 }
0x118f   :  { %v725_v3 = vpop.f32.mrb[6].mxu0 }
0x1190   :  { %v729_v4 = vadd.f32 %v725_v3, %v653_v2  ;;  %v1086_v6 = vpop.f32.mrb[7].mxu0 }
0x1192   :  { %v730_v8 = vmul.f32 %v729_v4, %v1356_v14 }
0x1194   :  { %1197 = vtanh.f32 %v730_v8 }
0x119e   :  { %v1198_v9 = vpop.eup %1197 }
0x119f   :  { %v732_v10 = vmul.f32 0.5, %v1198_v9 }
0x11a1   :  { %v733_v12 = vadd.f32 0.5, %v732_v10 }
0x11a3   :  { %v734_v13 = vsel %vm1350_vm4, %v1198_v9, %v733_v12 }
0x11a4   :  { %737 = vrot.lane.b32.xlu1 %v734_v13, %s1260_s1  ;;  %v735_v1 = vmul.f32 %v734_v13, %v645_v59 }
0x1216   :  { %v738_v15 = vpop.permute.xlu1 %737 }
0x1217   :  { %v740_v16 = vmul.f32 %v738_v15, %v734_v13 }
0x1219   :  { %742 = vrot.lane.b32.xlu0 %v740_v16, %s1261_s21 }
0x128b   :  { %v743_v17 = vpop.permute.xlu0 %742 }
0x128c   :  { %v745_v18 = vadd.f32 %v743_v17, %v735_v1 }
0x128e   :  { %1199 = vtanh.f32 %v745_v18 }
0x1298   :  { %v1200_v19 = vpop.eup %1199 }
0x1299   :  { %748 = vrot.lane.b32.xlu1 %v1200_v19, %s1260_s1 }
0x130b   :  { %v749_v20 = vpop.permute.xlu1 %748 }
0x130c   :  { %v751_v21 = vmul.f32 %v749_v20, %v734_v13 }
0x130e   :  { %755 = vrot.lane.b32.xlu0 %v751_v21, %s1261_s21 }
0x1380   :  { %v756_v22 = vpop.permute.xlu0 %755 }
0x1381   :  { %1096 = vmatmul.mubr.msk.f32.vlgmr.msra.gmra.mrb[6].mxu1 %vm51_vm1, %v756_v22 }
0x1454   :  { %v825_v24 = vpop.f32.mrb[6].mxu1 }
0x1455   :  { %v829_v25 = vadd.f32 %v825_v24, %v753_v23  ;;  %v1097_v26 = vpop.f32.mrb[7].mxu1 }
0x1457   :  { %v830_v27 = vmul.f32 %v829_v25, %v1356_v14  ;;  %v852_v14 = vld [vmem:[%s1489_s4] sm:$0xff]  ;;  %s1262_s4 = smov [#allocation5]  }
0x1458   :  { %v1158_v38 = vpack.c.bf16 %v853_v37, %v852_v14  ;;  %s946_s7 = sshll.u32 %s1262_s4, 4  ;;  %s947_s7 = int_to_ptr.vmem [resolvable:$true] %s946_s7 }
0x1459   :  { %1201 = vtanh.f32 %v830_v27  ;;  %s1227_s8 = scalar_lea.vmem %s947_s7, 128  ;;  %p1232_p9 = scmp.lt.s32.totalorder %s947_s7, %s947_s7 }
0x145a   :  { %1159 = vmatpush3.bf16.msra.mxu0 %v1158_v38  ;;  %p1228_p8 = scmp.ne.s32.totalorder %s947_s7, %s1227_s8  ;;  %p1233_p10 = scmp.lt.s32.totalorder %s1227_s8, %s1227_s8 }
0x145b   :  { %1160 = vmatprep.subr.bf16.mxu0 %v1256_v0 }
0x145c   :  { %p1234_p11 = por %p1233_p10, %p1232_p9 }
0x145e   :  { %1162 = vmatpush3.bf16.msra.mxu0 %v1161_v40  ;;  %p1235_p12 = pnand %p1234_p11, %p1228_p8 }
0x1463   :  { %v1202_v28 = vpop.eup %1201 }
0x1464   :  { %v832_v29 = vmul.f32 0.5, %v1202_v28 }
0x1466   :  { %v833_v30 = vadd.f32 0.5, %v832_v29 }
0x1468   :  { %v834_v31 = vsel %vm1350_vm4, %v1202_v28, %v833_v30 }
0x1469   :  { %837 = vrot.lane.b32.xlu1 %v834_v31, %s1260_s1  ;;  %v835_v34 = vmul.f32 %v834_v31, %v745_v18 }
0x14db   :  { %v838_v32 = vpop.permute.xlu1 %837 }
0x14dc   :  { %v840_v33 = vmul.f32 %v838_v32, %v834_v31 }
0x14de   :  { %842 = vrot.lane.b32.xlu0 %v840_v33, %s1261_s21 }
0x1550   :  { %v843_v35 = vpop.permute.xlu0 %842 }
0x1551   :  { %v845_v36 = vadd.f32 %v843_v35, %v835_v34 }
0x1553   :  { %1203 = vtanh.f32 %v845_v36 }
0x155d   :  { %v1204_v41 = vpop.eup %1203 }
0x155e   :  { %848 = vrot.lane.b32.xlu1 %v1204_v41, %s1260_s1 }
0x15d0   :  { %v849_v42 = vpop.permute.xlu1 %848 }
0x15d1   :  { %v851_v43 = vmul.f32 %v849_v42, %v834_v31 }
0x15d3   :  { %864 = vrot.lane.b32.xlu0 %v851_v43, %s1261_s21 }
0x1645   :  { %v865_v44 = vpop.permute.xlu0 %864 }
0x1646   :  { %1107 = vmatmul.mubr.msk.f32.vlgmr.msra.gmra.mrb[8].mxu0 %vm51_vm1, %v865_v44 }
0x1719   :  { %v934_v46 = vpop.f32.mrb[8].mxu0 }
0x171a   :  { %v935_v0 = vadd.f32 %v963_v45, %v934_v46  ;;  %v1108_v47 = vpop.f32.mrb[9].mxu0 }
0x171c   :  { %939 = vst.msk [vmem:[#allocation5] sm:$0xff] %vm938_vm5, %v935_v0 }
0x171d   :  { %1238 = shalt.err (!%p1235_p12)
}
0x171e   :  { %s1239_s11 = scalar_lea.hbm %s1491_s6, 128 }
0x171f   :  { %p1240_p13 = scmp.ne.s32.totalorder %s1491_s6, %s1239_s11  ;;  %p1243_p0 = scmp.lt.u32.totalorder %s1239_s11, %s1491_s6 }
0x1721   :  { %p1245_p1 = pnand %p1243_p0, %p1240_p13 }
0x1723   :  { %1248 = shalt.err (!%p1245_p1)
}
0x1724   :  { %949 = dma.vmem_to_hbm [thread:$0]  %s947_s7, 128, %s1491_s6, [#allocation4]  }
0x1725   :  { %1251 = dma.done.wait [#allocation4], 128  }
0x1726   :  { %1252 = vsyncadd [#allocation4], 4294967168 }
0x1727   :  { %953 = vsyncpa [#allocation3], 1 }
0x1728   :  { %954 = vsyncpa [#allocation4], 1 }

</bundles_post_ra>
